<compile_context>
chip_gen: v6e
topology: v6e:2x2x1
jax: 0.10.0
libtpu: 0.0.40
codegen_flags: <defaults>
</compile_context>

<pallas_src>
import jax
import jax.numpy as jnp
from jax.experimental import pallas as pl
from jax.experimental.pallas import tpu as pltpu

IN_FEATURES = 768          # 3 * 16 * 16
H1, H2, H3, OUT = 120, 64, 64, 2
PAD = 128                  # lane-aligned hidden width


def classifier_kernel(x_ref, w1_ref, b1_ref, w2_ref, b2_ref,
                      w3_ref, b3_ref, w4d_ref, b4d_ref, o_ref):
    # x arrives f32 (no wrapper-side convert pass over HBM); cast to bf16 only
    # as the MXU operand.  Accumulation / elementwise math stays f32.
    x = x_ref[...].astype(jnp.bfloat16)

    h1 = jnp.dot(x, w1_ref[...], preferred_element_type=jnp.float32) + b1_ref[...]
    h1 = jnp.maximum(h1, 0.0)
    # TODO(synk): dropout(p=0.2) skipped (eval-mode identity); training mode would
    #             need pltpu.prng_seed / pltpu.stateful_bernoulli masking.

    h2 = jnp.dot(h1.astype(jnp.bfloat16), w2_ref[...],
                 preferred_element_type=jnp.float32) + b2_ref[...]
    h2 = jnp.maximum(h2, 0.0)

    h3 = jnp.dot(h2.astype(jnp.bfloat16), w3_ref[...],
                 preferred_element_type=jnp.float32) + b3_ref[...]
    h3 = jnp.maximum(h3, 0.0)

    # Final 64->2 layer + 2-class log_softmax as a difference epilogue:
    #   d   = z1 - z0 = h3 @ (w4[:,1]-w4[:,0]) + (b4[1]-b4[0])
    #   lp0 = -softplus(d),  lp1 = d - softplus(d)
    # The lane reduce runs on the XLU (slack unit here); the fourth padded
    # 128x128 MXU pass and its exp/log over padded lanes are gone.
    d = jnp.sum(h3 * w4d_ref[...], axis=-1, keepdims=True) + b4d_ref[:, 0:1]
    sp = jnp.maximum(d, 0.0) + jnp.log1p(jnp.exp(-jnp.abs(d)))   # stable softplus(d)
    o_ref[:, 0:1] = -sp
    o_ref[:, 1:2] = d - sp


def _round_up(n, m):
    return ((n + m - 1) // m) * m


def prepare_params(params):
    """Pad hidden widths to 128 lanes; cast the three MXU weight operands to
    bf16 (biases stay f32 for the VPU add).  The final (64, 2) layer is folded
    into an f32 difference row (w4d) + scalar (b4d) for the epilogue."""
    def pad(w, b, in_pad, out_pad):
        wi, wo = w.shape
        wp = jnp.zeros((in_pad, out_pad), jnp.float32).at[:wi, :wo].set(w)
        bp = jnp.zeros((1, out_pad), jnp.float32).at[0, :wo].set(b)
        return wp.astype(jnp.bfloat16), bp

    (w1, b1), (w2, b2), (w3, b3), (w4, b4) = params
    w4d = jnp.zeros((1, PAD), jnp.float32).at[0, :H3].set(w4[:, 1] - w4[:, 0])
    b4d = jnp.zeros((1, PAD), jnp.float32).at[0, 0].set(b4[1] - b4[0])
    return (pad(w1, b1, IN_FEATURES, PAD),
            pad(w2, b2, PAD, PAD),
            pad(w3, b3, PAD, PAD),
            (w4d, b4d))


def classifier_forward(x, params, *, tile_b=2048):
    """x: (B, C, H, W) float32, flattened inside (torch .view semantics)."""
    B = x.shape[0]
    x2d = x.reshape(B, -1)          # free view; stays f32 -> no extra HBM pass
    assert x2d.shape[1] == IN_FEATURES

    # Batch tiling:
    #  * rounded to 16 sublanes (bf16 packing inside the kernel),
    #  * TILE_B is a near-divisor of B so padding stays under one tile,
    #  * >= 2 grid steps whenever the batch allows, so the "parallel" axis
    #    actually shards across v7x's two TensorCores.
    B16 = _round_up(B, 16)
    n_tiles = max(pl.cdiv(B16, tile_b), 2) if B16 >= 32 else 1
    TILE_B = _round_up(pl.cdiv(B16, n_tiles), 16)
    grid_n = pl.cdiv(B16, TILE_B)
    B_pad = grid_n * TILE_B
    if B_pad != B:
        x2d = jnp.pad(x2d, ((0, B_pad - B), (0, 0)))

    (w1, b1), (w2, b2), (w3, b3), (w4d, b4d) = prepare_params(params)

    full = lambda i: (0, 0)     # weights/biases stay VMEM-resident across the grid

    # Explicit VMEM budget: double-buffered f32 x tiles dominate; leave margin
    # for bf16/f32 activation temporaries plus the (tiny) resident weights.
    vmem_budget = (
        2 * TILE_B * IN_FEATURES * 4                   # x double buffer (f32)
        + TILE_B * (IN_FEATURES * 2 + 6 * PAD * 4)     # in-kernel temporaries
        + 2 * (IN_FEATURES + 2 * PAD) * PAD * 2        # weights (bf16, 2 bufs)
        + 2 * 8 * PAD * 4                              # biases / w4d rows
        + 2 * TILE_B * OUT * 4)                        # output double buffer
    vmem_limit = min(max(int(vmem_budget * 1.5), 32 << 20), 60 << 20)

    flops = 2 * B_pad * (IN_FEATURES * PAD + 2 * PAD * PAD + PAD)
    bytes_accessed = (B_pad * IN_FEATURES * 4 + B_pad * OUT * 4
                      + (IN_FEATURES + 2 * PAD) * PAD * 2 + 6 * PAD * 4)

    out = pl.pallas_call(
        classifier_kernel,
        out_shape=jax.ShapeDtypeStruct((B_pad, OUT), jnp.float32),
        grid=(grid_n,),
        in_specs=[
            pl.BlockSpec((TILE_B, IN_FEATURES), lambda i: (i, 0)),
            pl.BlockSpec((IN_FEATURES, PAD), full), pl.BlockSpec((1, PAD), full),
            pl.BlockSpec((PAD, PAD), full),         pl.BlockSpec((1, PAD), full),
            pl.BlockSpec((PAD, PAD), full),         pl.BlockSpec((1, PAD), full),
            pl.BlockSpec((1, PAD), full),           pl.BlockSpec((1, PAD), full),
        ],
        out_specs=pl.BlockSpec((TILE_B, OUT), lambda i: (i, 0)),
        compiler_params=pltpu.CompilerParams(
            dimension_semantics=("parallel",),
            vmem_limit_bytes=vmem_limit),
        cost_estimate=pl.CostEstimate(
            flops=flops, transcendentals=B_pad, bytes_accessed=bytes_accessed),
    )(x2d, w1, b1, w2, b2, w3, b3, w4d, b4d)

    return out[:B]


def init_linear(key, fan_in, fan_out):
    # PyTorch nn.Linear default init: U(-1/sqrt(fan_in), 1/sqrt(fan_in)).
    # Stored as (in, out) so the kernel computes x @ W (== torch x @ W.T).
    kw, kb = jax.random.split(key)
    bound = 1.0 / (fan_in ** 0.5)
    w = jax.random.uniform(kw, (fan_in, fan_out), jnp.float32, -bound, bound)
    b = jax.random.uniform(kb, (fan_out,), jnp.float32, -bound, bound)
    return w, b


def classifier_reference(x, params):
    (w1, b1), (w2, b2), (w3, b3), (w4, b4) = params
    h = x.reshape(x.shape[0], -1)
    h = jnp.maximum(h @ w1 + b1, 0.0)
    h = jnp.maximum(h @ w2 + b2, 0.0)
    h = jnp.maximum(h @ w3 + b3, 0.0)
    logits = h @ w4 + b4
    return jax.nn.log_softmax(logits, axis=1)


if __name__ == "__main__":
    key = jax.random.PRNGKey(0)
    kx, k1, k2, k3, k4 = jax.random.split(key, 5)

    # Small, shape-consistent input: (B=2, C=3, H=16, W=16) -> 3*16*16 = 768 features
    x = jax.random.normal(kx, (2, 3, 16, 16), dtype=jnp.float32)

    params = (
        init_linear(k1, IN_FEATURES, H1),
        init_linear(k2, H1, H2),
        init_linear(k3, H2, H3),
        init_linear(k4, H3, OUT),
    )

    out = classifier_forward(x, params)
    out = jax.block_until_ready(out)

    assert out.shape == (2, 2)
    # log_softmax rows sum to ~1 in prob space
    assert jnp.allclose(jnp.sum(jnp.exp(out), axis=1), 1.0, atol=1e-4)
    # matches the pure-JAX f32 reference up to bf16 matmul-input rounding
    ref = classifier_reference(x, params)
    assert jnp.allclose(out, ref, atol=8e-2), (out, ref)

    print("KERNEL_OK")
</pallas_src>

<mosaic_0001>
module attributes {stable_mosaic.version = 11 : i64} {
  func.func @classifier_kernel(%arg0: i32, %arg1: memref<16x768xf32, #tpu.memory_space<vmem>>, %arg2: memref<768x128xbf16, #tpu.memory_space<vmem>>, %arg3: memref<1x128xf32, #tpu.memory_space<vmem>>, %arg4: memref<128x128xbf16, #tpu.memory_space<vmem>>, %arg5: memref<1x128xf32, #tpu.memory_space<vmem>>, %arg6: memref<128x128xbf16, #tpu.memory_space<vmem>>, %arg7: memref<1x128xf32, #tpu.memory_space<vmem>>, %arg8: memref<1x128xf32, #tpu.memory_space<vmem>>, %arg9: memref<1x128xf32, #tpu.memory_space<vmem>>, %arg10: memref<16x2xf32, #tpu.memory_space<vmem>>) attributes {dimension_semantics = [#tpu.dimension_semantics<parallel>], iteration_bounds = array<i64: 1>, scalar_prefetch = 0 : i64, scratch_operands = 0 : i64, tpu.core_type = #tpu.core_type<tc>, window_params = [{transform_indices = @transform_0, window_bounds = array<i64: 16, 768>}, {pipeline_mode = #tpu.pipeline_mode<synchronous>, transform_indices = @transform_1, window_bounds = array<i64: 768, 128>}, {pipeline_mode = #tpu.pipeline_mode<synchronous>, transform_indices = @transform_2, window_bounds = array<i64: 1, 128>}, {pipeline_mode = #tpu.pipeline_mode<synchronous>, transform_indices = @transform_3, window_bounds = array<i64: 128, 128>}, {pipeline_mode = #tpu.pipeline_mode<synchronous>, transform_indices = @transform_4, window_bounds = array<i64: 1, 128>}, {pipeline_mode = #tpu.pipeline_mode<synchronous>, transform_indices = @transform_5, window_bounds = array<i64: 128, 128>}, {pipeline_mode = #tpu.pipeline_mode<synchronous>, transform_indices = @transform_6, window_bounds = array<i64: 1, 128>}, {pipeline_mode = #tpu.pipeline_mode<synchronous>, transform_indices = @transform_7, window_bounds = array<i64: 1, 128>}, {pipeline_mode = #tpu.pipeline_mode<synchronous>, transform_indices = @transform_8, window_bounds = array<i64: 1, 128>}, {transform_indices = @transform_9, window_bounds = array<i64: 16, 2>}]} {
    %c0 = arith.constant 0 : index
    %c0_0 = arith.constant 0 : index
    %0 = vector.load %arg1[%c0, %c0_0] : memref<16x768xf32, #tpu.memory_space<vmem>>, vector<16x768xf32>
    %1 = arith.truncf %0 : vector<16x768xf32> to vector<16x768xbf16>
    %c0_1 = arith.constant 0 : index
    %c0_2 = arith.constant 0 : index
    %2 = vector.load %arg2[%c0_1, %c0_2] : memref<768x128xbf16, #tpu.memory_space<vmem>>, vector<768x128xbf16>
    %cst = arith.constant dense<0.000000e+00> : vector<16x128xf32>
    %3 = tpu.matmul %1, %2, %cst {dimension_numbers = #tpu.dot_dimension_numbers<[1], [0], [0], [1], [0, 0, 1, 1], [], []>} : vector<16x768xbf16>, vector<768x128xbf16>, vector<16x128xf32> -> vector<16x128xf32>
    %c0_3 = arith.constant 0 : index
    %c0_4 = arith.constant 0 : index
    %4 = vector.load %arg3[%c0_3, %c0_4] : memref<1x128xf32, #tpu.memory_space<vmem>>, vector<1x128xf32>
    %5 = vector.broadcast %4 : vector<1x128xf32> to vector<16x128xf32>
    %6 = arith.addf %3, %5 : vector<16x128xf32>
    %cst_5 = arith.constant 0.000000e+00 : f32
    %7 = vector.broadcast %cst_5 : f32 to vector<16x128xf32>
    %8 = arith.maximumf %6, %7 : vector<16x128xf32>
    %9 = arith.truncf %8 : vector<16x128xf32> to vector<16x128xbf16>
    %c0_6 = arith.constant 0 : index
    %c0_7 = arith.constant 0 : index
    %10 = vector.load %arg4[%c0_6, %c0_7] : memref<128x128xbf16, #tpu.memory_space<vmem>>, vector<128x128xbf16>
    %cst_8 = arith.constant dense<0.000000e+00> : vector<16x128xf32>
    %11 = tpu.matmul %9, %10, %cst_8 {dimension_numbers = #tpu.dot_dimension_numbers<[1], [0], [0], [1], [0, 0, 1, 1], [], []>} : vector<16x128xbf16>, vector<128x128xbf16>, vector<16x128xf32> -> vector<16x128xf32>
    %c0_9 = arith.constant 0 : index
    %c0_10 = arith.constant 0 : index
    %12 = vector.load %arg5[%c0_9, %c0_10] : memref<1x128xf32, #tpu.memory_space<vmem>>, vector<1x128xf32>
    %13 = vector.broadcast %12 : vector<1x128xf32> to vector<16x128xf32>
    %14 = arith.addf %11, %13 : vector<16x128xf32>
    %cst_11 = arith.constant 0.000000e+00 : f32
    %15 = vector.broadcast %cst_11 : f32 to vector<16x128xf32>
    %16 = arith.maximumf %14, %15 : vector<16x128xf32>
    %17 = arith.truncf %16 : vector<16x128xf32> to vector<16x128xbf16>
    %c0_12 = arith.constant 0 : index
    %c0_13 = arith.constant 0 : index
    %18 = vector.load %arg6[%c0_12, %c0_13] : memref<128x128xbf16, #tpu.memory_space<vmem>>, vector<128x128xbf16>
    %cst_14 = arith.constant dense<0.000000e+00> : vector<16x128xf32>
    %19 = tpu.matmul %17, %18, %cst_14 {dimension_numbers = #tpu.dot_dimension_numbers<[1], [0], [0], [1], [0, 0, 1, 1], [], []>} : vector<16x128xbf16>, vector<128x128xbf16>, vector<16x128xf32> -> vector<16x128xf32>
    %c0_15 = arith.constant 0 : index
    %c0_16 = arith.constant 0 : index
    %20 = vector.load %arg7[%c0_15, %c0_16] : memref<1x128xf32, #tpu.memory_space<vmem>>, vector<1x128xf32>
    %21 = vector.broadcast %20 : vector<1x128xf32> to vector<16x128xf32>
    %22 = arith.addf %19, %21 : vector<16x128xf32>
    %cst_17 = arith.constant 0.000000e+00 : f32
    %23 = vector.broadcast %cst_17 : f32 to vector<16x128xf32>
    %24 = arith.maximumf %22, %23 : vector<16x128xf32>
    %c0_18 = arith.constant 0 : index
    %c0_19 = arith.constant 0 : index
    %25 = vector.load %arg8[%c0_18, %c0_19] : memref<1x128xf32, #tpu.memory_space<vmem>>, vector<1x128xf32>
    %26 = vector.broadcast %25 : vector<1x128xf32> to vector<16x128xf32>
    %27 = arith.mulf %24, %26 : vector<16x128xf32>
    %cst_20 = arith.constant dense<0.000000e+00> : vector<16xf32>
    %28 = vector.multi_reduction <add>, %27, %cst_20 [1] : vector<16x128xf32> to vector<16xf32>
    %29 = vector.shape_cast %28 : vector<16xf32> to vector<16x1xf32>
    %c0_21 = arith.constant 0 : index
    %c0_22 = arith.constant 0 : index
    %30 = vector.load %arg9[%c0_21, %c0_22] : memref<1x128xf32, #tpu.memory_space<vmem>>, vector<1x1xf32>
    %31 = vector.broadcast %30 : vector<1x1xf32> to vector<16x1xf32>
    %32 = arith.addf %29, %31 : vector<16x1xf32>
    %cst_23 = arith.constant 0.000000e+00 : f32
    %33 = vector.broadcast %cst_23 : f32 to vector<16x1xf32>
    %34 = arith.maximumf %32, %33 : vector<16x1xf32>
    %35 = math.absf %32 : vector<16x1xf32>
    %cst_24 = arith.constant 0.000000e+00 : f32
    %36 = vector.broadcast %cst_24 : f32 to vector<16x1xf32>
    %37 = arith.subf %36, %35 : vector<16x1xf32>
    %38 = math.exp %37 : vector<16x1xf32>
    %39 = math.log1p %38 : vector<16x1xf32>
    %40 = arith.addf %34, %39 : vector<16x1xf32>
    %cst_25 = arith.constant 0.000000e+00 : f32
    %41 = vector.broadcast %cst_25 : f32 to vector<16x1xf32>
    %42 = arith.subf %41, %40 : vector<16x1xf32>
    %c0_26 = arith.constant 0 : index
    %c0_27 = arith.constant 0 : index
    %43 = vector.load %arg10[%c0_26, %c0_27] : memref<16x2xf32, #tpu.memory_space<vmem>>, vector<16x1xf32>
    tpu.vector_store %arg10[%c0_26, %c0_27], %42 {strides = array<i32>} : memref<16x2xf32, #tpu.memory_space<vmem>>, vector<16x1xf32>,
    %44 = arith.subf %32, %40 : vector<16x1xf32>
    %c0_28 = arith.constant 0 : index
    %c1 = arith.constant 1 : index
    %45 = vector.load %arg10[%c0_28, %c1] : memref<16x2xf32, #tpu.memory_space<vmem>>, vector<16x1xf32>
    tpu.vector_store %arg10[%c0_28, %c1], %44 {strides = array<i32>} : memref<16x2xf32, #tpu.memory_space<vmem>>, vector<16x1xf32>,
    return
  }
  func.func @transform_0(%arg0: i32) -> (i32, i32) {
    %c0_i32 = arith.constant 0 : i32
    %c0_i32_0 = arith.constant 0 : i32
    return %arg0, %c0_i32 : i32, i32
  }
  func.func @transform_1(%arg0: i32) -> (i32, i32) {
    %c0_i32 = arith.constant 0 : i32
    %c0_i32_0 = arith.constant 0 : i32
    %c0_i32_1 = arith.constant 0 : i32
    return %c0_i32, %c0_i32_0 : i32, i32
  }
  func.func @transform_2(%arg0: i32) -> (i32, i32) {
    %c0_i32 = arith.constant 0 : i32
    %c0_i32_0 = arith.constant 0 : i32
    %c0_i32_1 = arith.constant 0 : i32
    return %c0_i32, %c0_i32_0 : i32, i32
  }
  func.func @transform_3(%arg0: i32) -> (i32, i32) {
    %c0_i32 = arith.constant 0 : i32
    %c0_i32_0 = arith.constant 0 : i32
    %c0_i32_1 = arith.constant 0 : i32
    return %c0_i32, %c0_i32_0 : i32, i32
  }
  func.func @transform_4(%arg0: i32) -> (i32, i32) {
    %c0_i32 = arith.constant 0 : i32
    %c0_i32_0 = arith.constant 0 : i32
    %c0_i32_1 = arith.constant 0 : i32
    return %c0_i32, %c0_i32_0 : i32, i32
  }
  func.func @transform_5(%arg0: i32) -> (i32, i32) {
    %c0_i32 = arith.constant 0 : i32
    %c0_i32_0 = arith.constant 0 : i32
    %c0_i32_1 = arith.constant 0 : i32
    return %c0_i32, %c0_i32_0 : i32, i32
  }
  func.func @transform_6(%arg0: i32) -> (i32, i32) {
    %c0_i32 = arith.constant 0 : i32
    %c0_i32_0 = arith.constant 0 : i32
    %c0_i32_1 = arith.constant 0 : i32
    return %c0_i32, %c0_i32_0 : i32, i32
  }
  func.func @transform_7(%arg0: i32) -> (i32, i32) {
    %c0_i32 = arith.constant 0 : i32
    %c0_i32_0 = arith.constant 0 : i32
    %c0_i32_1 = arith.constant 0 : i32
    return %c0_i32, %c0_i32_0 : i32, i32
  }
  func.func @transform_8(%arg0: i32) -> (i32, i32) {
    %c0_i32 = arith.constant 0 : i32
    %c0_i32_0 = arith.constant 0 : i32
    %c0_i32_1 = arith.constant 0 : i32
    return %c0_i32, %c0_i32_0 : i32, i32
  }
  func.func @transform_9(%arg0: i32) -> (i32, i32) {
    %c0_i32 = arith.constant 0 : i32
    %c0_i32_0 = arith.constant 0 : i32
    return %arg0, %c0_i32 : i32, i32
  }
}

</mosaic_0001>

<bundles_post_ra>
// kernel: tpu_custom_call.1
= control target key start
LH: loop header
LB: loop body
LE: loop exit
PB: predicated region body
PF: predicated region fallthrough
CT: control target
= control target key end

     0   :  { %14 = vsyncpa [#allocation3], 0  ;;  %s1418_s0 = inlined_call_operand.hbm [shape: f32[16,768], index: 0, kind: input, shape index: {}]   ;;  %s1419_s1 = inlined_call_operand.hbm [shape: bf16[768,128], index: 1, kind: input, shape index: {}]   ;;  %s1420_s2 = inlined_call_operand.vmem [shape: f32[1,128], index: 2, kind: input, shape index: {}]   ;;  %s1421_s3 = inlined_call_operand.hbm [shape: bf16[128,128], index: 3, kind: input, shape index: {}]   ;;  %s1422_s4 = inlined_call_operand.vmem [shape: f32[1,128], index: 4, kind: input, shape index: {}]   ;;  %s1423_s5 = inlined_call_operand.hbm [shape: bf16[128,128], index: 5, kind: input, shape index: {}]   ;;  %s1424_s6 = inlined_call_operand.vmem [shape: f32[1,128], index: 6, kind: input, shape index: {}]   ;;  %s1425_s7 = inlined_call_operand.vmem [shape: f32[1,128], index: 7, kind: input, shape index: {}]   ;;  %s1426_s8 = inlined_call_operand.vmem [shape: f32[1,128], index: 8, kind: input, shape index: {}]   ;;  %s1427_s9 = inlined_call_operand.vmem [shape: f32[16,2], index: 9, kind: output, shape index: {}]  }
   0x1   :  { %15 = vsyncpa [#allocation5], 0 }
   0x2   :  { %16 = vsyncpa [#allocation8], 0  ;;  %s1291_s30 = smov [#allocation4]  }
   0x3   :  { %s34_s10 = sshll.u32 %s1291_s30, 4  ;;  %s35_s10 = int_to_ptr.vmem [resolvable:$true] %s34_s10 }
   0x4   :  { %s1213_s11 = scalar_lea.vmem %s35_s10, 6144  ;;  %p1218_p1 = scmp.lt.s32.totalorder %s35_s10, %s35_s10 }
   0x5   :  { %p1214_p0 = scmp.ne.s32.totalorder %s35_s10, %s1213_s11  ;;  %p1219_p2 = scmp.lt.s32.totalorder %s1213_s11, %s1213_s11 }
   0x7   :  { %p1220_p3 = por %p1219_p2, %p1218_p1 }
   0x9   :  { %p1221_p4 = pnand %p1220_p3, %p1214_p0 }
   0xb   :  { %1224 = shalt.err (!%p1221_p4)
}
   0xc   :  { %s1292_s12 = smov 64   ;;  %s1293_s13 = smov 4  }
   0xd   :  { %40 = dma.hbm_to_vmem [thread:$0]  %s1419_s1, 6144, %s35_s10, [#allocation5], %s1292_s12, %s1292_s12, %s1293_s13  }
   0xe   :  { %s1294_s16 = smov [#allocation2]  }
   0xf   :  { %s22_s17 = sshll.u32 %s1294_s16, 4  ;;  %s23_s17 = int_to_ptr.vmem [resolvable:$true] %s22_s17 }
  0x10   :  { %s1233_s18 = scalar_lea.vmem %s23_s17, 1536  ;;  %p1238_p6 = scmp.lt.s32.totalorder %s23_s17, %s23_s17 }
  0x11   :  { %p1234_p5 = scmp.ne.s32.totalorder %s23_s17, %s1233_s18  ;;  %p1239_p7 = scmp.lt.s32.totalorder %s1233_s18, %s1233_s18 }
  0x13   :  { %p1240_p8 = por %p1239_p7, %p1238_p6 }
  0x15   :  { %p1241_p9 = pnand %p1240_p8, %p1234_p5 }
  0x17   :  { %1244 = shalt.err (!%p1241_p9)
}
  0x18   :  { %s1295_s19 = smov 768   ;;  %s1296_s20 = smov 48  }
  0x19   :  { %28 = dma.hbm_to_vmem [thread:$0]  %s1418_s0, 1536, %s23_s17, [#allocation3], %s1295_s19, %s1295_s19, %s1296_s20  }
  0x1a   :  { %s1297_s23 = smov [#allocation6]   ;;  %s1298_s25 = smov [#allocation7]  }
  0x1b   :  { %s48_s24 = sshll.u32 %s1297_s23, 4  ;;  %s62_s1 = sshll.u32 %s1298_s25, 4  ;;  %s49_s24 = int_to_ptr.vmem [resolvable:$true] %s48_s24  ;;  %s63_s1 = int_to_ptr.vmem [resolvable:$true] %s62_s1 }
  0x1c   :  { %s1253_s26 = scalar_lea.vmem %s49_s24, 1024  ;;  %p1258_p11 = scmp.lt.s32.totalorder %s49_s24, %s49_s24 }
  0x1d   :  { %p1254_p10 = scmp.ne.s32.totalorder %s49_s24, %s1253_s26  ;;  %p1259_p12 = scmp.lt.s32.totalorder %s1253_s26, %s1253_s26 }
  0x1f   :  { %p1260_p13 = por %p1259_p12, %p1258_p11 }
  0x21   :  { %p1261_p0 = pnand %p1260_p13, %p1254_p10 }
  0x23   :  { %1264 = shalt.err (!%p1261_p0)
}
  0x24   :  { %54 = dma.hbm_to_vmem [thread:$0]  %s1421_s3, 1024, %s49_s24, [#allocation5], %s1292_s12, %s1292_s12, %s1293_s13  }
  0x25   :  { %s1273_s0 = scalar_lea.vmem %s63_s1, 1024  ;;  %p1278_p2 = scmp.lt.s32.totalorder %s63_s1, %s63_s1 }
  0x26   :  { %p1274_p1 = scmp.ne.s32.totalorder %s63_s1, %s1273_s0  ;;  %p1279_p3 = scmp.lt.s32.totalorder %s1273_s0, %s1273_s0 }
  0x28   :  { %p1280_p4 = por %p1279_p3, %p1278_p2 }
  0x2a   :  { %p1281_p5 = pnand %p1280_p4, %p1274_p1 }
  0x2c   :  { %1284 = shalt.err (!%p1281_p5)
}
  0x2d   :  { %68 = dma.hbm_to_vmem [thread:$0]  %s1423_s5, 1024, %s63_s1, [#allocation8], %s1292_s12, %s1292_s12, %s1293_s13  }
  0x2e   :  { %1285 = dma.done.wait [#allocation3], 1536  }
  0x2f   :  { %1286 = vsyncadd [#allocation3], 4294965760 }
  0x30   :  { %1287 = dma.done.wait [#allocation5], 7168  }
  0x31   :  { %1288 = vsyncadd [#allocation5], 4294960128 }
  0x32   :  { %1289 = dma.done.wait [#allocation8], 1024  }
  0x33   :  { %1290 = vsyncadd [#allocation8], 4294966272  ;;  %v1133_v0 = vld [vmem:[#allocation4 + $0x78] sm:$0xff]   ;;  %v1137_v4 = vld [vmem:[#allocation4 + $0x70] sm:$0xff]   ;;  %vm1300_vm0 = vmmov 0   ;;  %vm906_vm2 = vcmask 7168  }
  0x34   :  { %v1134_v1 = vld [vmem:[#allocation4 + $0x38] sm:$0xff]   ;;  %998 = vmatprep.subr.bf16.mxu0 %v1133_v0  ;;  %v1138_v5 = vld [vmem:[#allocation4 + $0x30] sm:$0xff]   ;;  %v1141_v8 = vld [vmem:[#allocation4 + $0x68] sm:$0xff]   ;;  %vm919_vm4 = vcmask 15368  }
  0x35   :  { %v1135_v2 = vld [vmem:[#allocation4 + $0xf8] sm:$0xff]   ;;  %999 = vmatpush3.bf16.msra.mxu0 %v1134_v1  ;;  %v1139_v6 = vld [vmem:[#allocation4 + $0xf0] sm:$0xff]   ;;  %v1142_v9 = vld [vmem:[#allocation4 + $0x28] sm:$0xff]  }
  0x36   :  { %v1136_v3 = vld [vmem:[#allocation4 + $0xb8] sm:$0xff]   ;;  %1020 = vmatprep.subr.bf16.mxu1 %v1135_v2  ;;  %1000 = vmatprep.subr.bf16.mxu0 %v1137_v4  ;;  %v1140_v7 = vld [vmem:[#allocation4 + $0xb0] sm:$0xff]   ;;  %v1143_v10 = vld [vmem:[#allocation4 + $0xe8] sm:$0xff]  }
  0x37   :  { %1021 = vmatpush3.bf16.msra.mxu1 %v1136_v3  ;;  %v1144_v11 = vld [vmem:[#allocation4 + $0xa8] sm:$0xff]   ;;  %v1145_v12 = vld [vmem:[#allocation4 + $0x60] sm:$0xff]   ;;  %v1149_v16 = vld [vmem:[#allocation4 + $0x58] sm:$0xff]   ;;  %v1299_v3 = vmov 0.0  }
  0x38   :  { %1022 = vmatprep.subr.bf16.mxu1 %v1139_v6  ;;  %v1146_v13 = vld [vmem:[#allocation4 + $0x20] sm:$0xff]   ;;  %v1150_v17 = vld [vmem:[#allocation4 + $0x18] sm:$0xff]   ;;  %v1153_v20 = vld [vmem:[#allocation4 + $0x50] sm:$0xff]  }
  0x39   :  { %1001 = vmatpush3.bf16.msra.mxu0 %v1138_v5  ;;  %v1147_v14 = vld [vmem:[#allocation4 + $0xe0] sm:$0xff]   ;;  %v1151_v18 = vld [vmem:[#allocation4 + $0xd8] sm:$0xff]   ;;  %v1154_v21 = vld [vmem:[#allocation4 + $0x10] sm:$0xff]  }
  0x3a   :  { %1002 = vmatprep.subr.bf16.mxu0 %v1141_v8  ;;  %v1148_v15 = vld [vmem:[#allocation4 + $0xa0] sm:$0xff]   ;;  %v1152_v19 = vld [vmem:[#allocation4 + $0x98] sm:$0xff]   ;;  %v1155_v22 = vld [vmem:[#allocation4 + $0xd0] sm:$0xff]  }
  0x3b   :  { %1023 = vmatpush3.bf16.msra.mxu1 %v1140_v7  ;;  %v1156_v23 = vld [vmem:[#allocation4 + $0x90] sm:$0xff]   ;;  %v1157_v24 = vld [vmem:[#allocation4 + $0x48] sm:$0xff]   ;;  %v1161_v28 = vld [vmem:[#allocation4 + $0x40] sm:$0xff]  }
  0x3c   :  { %1024 = vmatprep.subr.bf16.mxu1 %v1143_v10  ;;  %v1158_v25 = vld [vmem:[#allocation4 + $0x8] sm:$0xff]   ;;  %v1162_v29 = vld [vmem:[#allocation4] sm:$0xff]   ;;  %v95_v32 = vld [vmem:[#allocation2 + $0x38] sm:$0xff] }
  0x3d   :  { %1003 = vmatpush3.bf16.msra.mxu0 %v1142_v9  ;;  %v1159_v26 = vld [vmem:[#allocation4 + $0xc8] sm:$0xff]   ;;  %v1163_v30 = vld [vmem:[#allocation4 + $0xc0] sm:$0xff]   ;;  %v94_v36 = vld [vmem:[#allocation2 + $0x30] sm:$0xff] }
  0x3e   :  { %1004 = vmatprep.subr.bf16.mxu0 %v1145_v12  ;;  %v1160_v27 = vld [vmem:[#allocation4 + $0x88] sm:$0xff]   ;;  %v1164_v34 = vld [vmem:[#allocation4 + $0x80] sm:$0xff]   ;;  %v1165_v38 = vld [vmem:[#allocation4 + $0x178] sm:$0xff]  }
  0x3f   :  { %1025 = vmatpush3.bf16.msra.mxu1 %v1144_v11  ;;  %v89_v31 = vld [vmem:[#allocation2 + $0x8] sm:$0xff]  ;;  %v88_v35 = vld [vmem:[#allocation2] sm:$0xff]  ;;  %v91_v39 = vld [vmem:[#allocation2 + $0x18] sm:$0xff] }
  0x40   :  { %1026 = vmatprep.subr.bf16.mxu1 %v1147_v14  ;;  %v101_v33 = vpack.c.bf16 %v95_v32, %v89_v31  ;;  %v100_v37 = vpack.c.bf16 %v94_v36, %v88_v35  ;;  %v97_v40 = vld [vmem:[#allocation2 + $0x48] sm:$0xff]  ;;  %v1166_v42 = vld [vmem:[#allocation4 + $0x138] sm:$0xff]   ;;  %v90_v43 = vld [vmem:[#allocation2 + $0x10] sm:$0xff] }
  0x41   :  { %1005 = vmatpush3.bf16.msra.mxu0 %v1146_v13  ;;  %v103_v41 = vpack.c.bf16 %v97_v40, %v91_v39  ;;  %v96_v44 = vld [vmem:[#allocation2 + $0x40] sm:$0xff]  ;;  %v1167_v46 = vld [vmem:[#allocation4 + $0x170] sm:$0xff]   ;;  %v1169_v48 = vld [vmem:[#allocation4 + $0x168] sm:$0xff]  }
  0x42   :  { %1006 = vmatprep.subr.bf16.mxu0 %v1149_v16  ;;  %529 = vmatprep.mubr.bf16.mxu0 %v101_v33  ;;  %v102_v45 = vpack.c.bf16 %v96_v44, %v90_v43  ;;  %v1168_v47 = vld [vmem:[#allocation4 + $0x130] sm:$0xff]   ;;  %v1170_v49 = vld [vmem:[#allocation4 + $0x128] sm:$0xff]   ;;  %v1171_v50 = vld [vmem:[#allocation4 + $0x160] sm:$0xff]  }
  0x43   :  { %1027 = vmatpush3.bf16.msra.mxu1 %v1148_v15  ;;  %570 = vmatprep.mubr.bf16.mxu1 %v103_v41  ;;  %v1172_v51 = vld [vmem:[#allocation4 + $0x120] sm:$0xff]   ;;  %v1173_v52 = vld [vmem:[#allocation4 + $0x158] sm:$0xff]   ;;  %v1175_v54 = vld [vmem:[#allocation4 + $0x150] sm:$0xff]  }
  0x44   :  { %1028 = vmatprep.subr.bf16.mxu1 %v1151_v18  ;;  %v1174_v53 = vld [vmem:[#allocation4 + $0x118] sm:$0xff]   ;;  %v93_v55 = vld [vmem:[#allocation2 + $0x28] sm:$0xff]  ;;  %v1176_v56 = vld [vmem:[#allocation4 + $0x110] sm:$0xff]  }
  0x45   :  { %1007 = vmatpush3.bf16.msra.mxu0 %v1150_v17  ;;  %v99_v57 = vld [vmem:[#allocation2 + $0x58] sm:$0xff]  ;;  %v1177_v58 = vld [vmem:[#allocation4 + $0x148] sm:$0xff]   ;;  %v1179_v61 = vld [vmem:[#allocation4 + $0x140] sm:$0xff]  }
  0x46   :  { %1008 = vmatprep.subr.bf16.mxu0 %v1153_v20  ;;  %v105_v59 = vpack.c.bf16 %v99_v57, %v93_v55  ;;  %v1178_v60 = vld [vmem:[#allocation4 + $0x108] sm:$0xff]   ;;  %v1180_v62 = vld [vmem:[#allocation4 + $0x100] sm:$0xff]   ;;  %v98_v0 = vld [vmem:[#allocation2 + $0x50] sm:$0xff] }
  0x47   :  { %1029 = vmatpush3.bf16.msra.mxu1 %v1152_v19  ;;  %v92_v63 = vld [vmem:[#allocation2 + $0x20] sm:$0xff]  ;;  %v1181_v2 = vld [vmem:[#allocation6 + $0x38] sm:$0xff]   ;;  %v1182_v4 = vld [vmem:[#allocation6 + $0x30] sm:$0xff]  }
  0x48   :  { %1030 = vmatprep.subr.bf16.mxu1 %v1155_v22  ;;  %v104_v1 = vpack.c.bf16 %v98_v0, %v92_v63  ;;  %v1183_v5 = vld [vmem:[#allocation6 + $0x28] sm:$0xff]   ;;  %v1184_v6 = vld [vmem:[#allocation6 + $0x20] sm:$0xff]   ;;  %v1185_v7 = vld [vmem:[#allocation6 + $0x18] sm:$0xff]  }
  0x49   :  { %1009 = vmatpush3.bf16.msra.mxu0 %v1154_v21  ;;  %v1186_v8 = vld [vmem:[#allocation6 + $0x10] sm:$0xff]   ;;  %v1187_v9 = vld [vmem:[#allocation6 + $0x8] sm:$0xff]   ;;  %v1188_v10 = vld [vmem:[#allocation6] sm:$0xff]  }
  0x4a   :  { %1010 = vmatprep.subr.bf16.mxu0 %v1157_v24  ;;  %v1189_v11 = vld [vmem:[#allocation7 + $0x38] sm:$0xff]   ;;  %v1190_v12 = vld [vmem:[#allocation7 + $0x30] sm:$0xff]   ;;  %v1191_v13 = vld [vmem:[#allocation7 + $0x28] sm:$0xff]  }
  0x4b   :  { %1031 = vmatpush3.bf16.msra.mxu1 %v1156_v23  ;;  %v1192_v14 = vld [vmem:[#allocation7 + $0x20] sm:$0xff]   ;;  %v1193_v15 = vld [vmem:[#allocation7 + $0x18] sm:$0xff]   ;;  %v1194_v44 = vld [vmem:[#allocation7 + $0x10] sm:$0xff]  }
  0x4c   :  { %1032 = vmatprep.subr.bf16.mxu1 %v1159_v26  ;;  %v929_v24 = vld [vmem:[%s1420_s2] ss:$0 sm:$0xff] }
  0x4d   :  { %1011 = vmatpush3.bf16.msra.mxu0 %v1158_v25  ;;  %v987_v57 = vld [vmem:[%s1424_s6] ss:$0 sm:$0xff]  ;;  %s1301_s6 = smov 1  }
  0x4e   :  { %1012 = vmatprep.subr.bf16.mxu0 %v1161_v28 }
  0x4f   :  { %1033 = vmatpush3.bf16.msra.mxu1 %v1160_v27 }
  0x50   :  { %1034 = vmatprep.subr.bf16.mxu1 %v1163_v30 }
  0x51   :  { %1013 = vmatpush3.bf16.msra.mxu0 %v1162_v29 }
  0x52   :  { %1042 = vmatprep.subr.bf16.mxu0 %v1165_v38 }
  0x53   :  { %1035 = vmatpush3.bf16.msra.mxu1 %v1164_v34 }
  0x54   :  { %530 = vmatmul.mubr.bf16.vlgmr.msra.gmra.mxu0 %v100_v37  ;;  %1082 = vmatprep.subr.bf16.mxu1 %v1299_v3 }
  0x55   :  { %1043 = vmatpush3.bf16.msra.mxu0 %v1166_v42  ;;  %611 = vmatprep.mubr.bf16.mxu0 %v105_v59 }
  0x56   :  { %571 = vmatmul.mubr.bf16.vlgmr.msra.gmra.mxu1 %v102_v45  ;;  %1044 = vmatprep.subr.bf16.mxu0 %v1167_v46  ;;  %v1195_v45 = vld [vmem:[#allocation7 + $0x8] sm:$0xff]   ;;  %v1196_v46 = vld [vmem:[#allocation7] sm:$0xff]  }
  0x57   :  { %1083 = vmatpush3.bf16.msra.mxu1 %v1181_v2  ;;  %1098 = vmatprep.mubr.msk.bf16.mxu1 %vm1300_vm0, %v1299_v3 }
  0x58   :  { %1084 = vmatprep.subr.bf16.mxu1 %v1299_v3 }
  0x59   :  { %1045 = vmatpush3.bf16.msra.mxu0 %v1168_v47  ;;  %v978_v47 = vld [vmem:[%s1422_s4] ss:$0 sm:$0xff] }
  0x5a   :  { %1046 = vmatprep.subr.bf16.mxu0 %v1169_v48 }
  0x5b   :  { %1085 = vmatpush3.bf16.msra.mxu1 %v1182_v4 }
  0x5c   :  { %1086 = vmatprep.subr.bf16.mxu1 %v1299_v3 }
  0x5d   :  { %1047 = vmatpush3.bf16.msra.mxu0 %v1170_v49 }
  0x5e   :  { %1048 = vmatprep.subr.bf16.mxu0 %v1171_v50 }
  0x5f   :  { %1087 = vmatpush3.bf16.msra.mxu1 %v1183_v5  ;;  %v997_v5 = vld [vmem:[%s1426_s8] ss:$0 sm:$0xff] }
  0x60   :  { %1088 = vmatprep.subr.bf16.mxu1 %v1299_v3 }
  0x61   :  { %1049 = vmatpush3.bf16.msra.mxu0 %v1172_v51 }
  0x62   :  { %1050 = vmatprep.subr.bf16.mxu0 %v1173_v52 }
  0x63   :  { %1089 = vmatpush3.bf16.msra.mxu1 %v1184_v6 }
  0x64   :  { %1090 = vmatprep.subr.bf16.mxu1 %v1299_v3 }
  0x65   :  { %1051 = vmatpush3.bf16.msra.mxu0 %v1174_v53 }
  0x66   :  { %1052 = vmatprep.subr.bf16.mxu0 %v1175_v54 }
  0x67   :  { %1091 = vmatpush3.bf16.msra.mxu1 %v1185_v7 }
  0x68   :  { %1092 = vmatprep.subr.bf16.mxu1 %v1299_v3 }
  0x69   :  { %1053 = vmatpush3.bf16.msra.mxu0 %v1176_v56 }
  0x6a   :  { %1054 = vmatprep.subr.bf16.mxu0 %v1177_v58 }
  0x6b   :  { %1093 = vmatpush3.bf16.msra.mxu1 %v1186_v8 }
  0x6c   :  { %1094 = vmatprep.subr.bf16.mxu1 %v1299_v3 }
  0x6d   :  { %1055 = vmatpush3.bf16.msra.mxu0 %v1178_v60 }
  0x6e   :  { %1056 = vmatprep.subr.bf16.mxu0 %v1179_v61  ;;  %v996_v61 = vld [vmem:[%s1425_s7] ss:$0 sm:$0xff] }
  0x6f   :  { %1095 = vmatpush3.bf16.msra.mxu1 %v1187_v9 }
  0x70   :  { %1096 = vmatprep.subr.bf16.mxu1 %v1299_v3 }
  0x71   :  { %1057 = vmatpush3.bf16.msra.mxu0 %v1180_v62 }
  0x72   :  { %1102 = vmatprep.subr.bf16.mxu0 %v1299_v3 }
  0x73   :  { %1097 = vmatpush3.bf16.msra.mxu1 %v1188_v10 }
  0x74   :  { %612 = vmatmul.mubr.bf16.vlgmr.msra.gmra.mxu0 %v104_v1 }
  0x75   :  { %1118 = vmatprep.mubr.msk.bf16.mxu0 %vm1300_vm0, %v1299_v3  ;;  %1103 = vmatpush3.bf16.msra.mxu0 %v1189_v11 }
  0x76   :  { %1104 = vmatprep.subr.bf16.mxu0 %v1299_v3 }
  0x79   :  { %1105 = vmatpush3.bf16.msra.mxu0 %v1190_v12 }
  0x7a   :  { %1106 = vmatprep.subr.bf16.mxu0 %v1299_v3 }
  0x7d   :  { %1107 = vmatpush3.bf16.msra.mxu0 %v1191_v13 }
  0x7e   :  { %1108 = vmatprep.subr.bf16.mxu0 %v1299_v3 }
  0x81   :  { %1109 = vmatpush3.bf16.msra.mxu0 %v1192_v14 }
  0x82   :  { %1110 = vmatprep.subr.bf16.mxu0 %v1299_v3 }
  0x85   :  { %1111 = vmatpush3.bf16.msra.mxu0 %v1193_v15 }
  0x86   :  { %1112 = vmatprep.subr.bf16.mxu0 %v1299_v3 }
  0x89   :  { %1113 = vmatpush3.bf16.msra.mxu0 %v1194_v44 }
  0x8a   :  { %1114 = vmatprep.subr.bf16.mxu0 %v1299_v3 }
  0x8d   :  { %1115 = vmatpush3.bf16.msra.mxu0 %v1195_v45 }
  0x8e   :  { %1116 = vmatprep.subr.bf16.mxu0 %v1299_v3 }
  0x91   :  { %1117 = vmatpush3.bf16.msra.mxu0 %v1196_v46 }
 0x114   :  { %v1014_v16 = vpop.f32.mrf.mxu0 }
 0x116   :  { %v1015_v17 = vpop.f32.mrf.mxu0  ;;  %v1036_v18 = vpop.f32.mrf.mxu1 }
 0x117   :  { %v1016_v23 = vadd.f32 %v1015_v17, %v1014_v16 }
 0x118   :  { %v1017_v19 = vpop.f32.mrf.mxu0  ;;  %v1037_v20 = vpop.f32.mrf.mxu1 }
 0x119   :  { %v532_v28 = vadd.f32 %v1016_v23, %v929_v24  ;;  %v1038_v29 = vadd.f32 %v1037_v20, %v1036_v18 }
 0x11a   :  { %v1018_v21 = vpop.f32.mrf.mxu0  ;;  %v1039_v22 = vpop.f32.mrf.mxu1 }
 0x11b   :  { %v1019_v25 = vadd.f32 %v1018_v21, %v1017_v19  ;;  %v573_v35 = vadd.f32 %v1038_v29, %v532_v28 }
 0x11c   :  { %v1040_v26 = vpop.f32.mrf.mxu1 }
 0x11d   :  { %v535_v31 = vadd.f32 %v1019_v25, %v929_v24  ;;  %v1041_v32 = vadd.f32 %v1040_v26, %v1039_v22 }
 0x11f   :  { %v576_v37 = vadd.f32 %v1041_v32, %v535_v31 }
 0x134   :  { %v1058_v27 = vpop.f32.mrf.mxu0 }
 0x136   :  { %v1059_v30 = vpop.f32.mrf.mxu0 }
 0x137   :  { %v1060_v33 = vadd.f32 %v1059_v30, %v1058_v27 }
 0x138   :  { %v1061_v34 = vpop.f32.mrf.mxu0 }
 0x139   :  { %v614_v38 = vadd.f32 %v1060_v33, %v573_v35 }
 0x13a   :  { %v1062_v36 = vpop.f32.mrf.mxu0 }
 0x13b   :  { %v1063_v39 = vadd.f32 %v1062_v36, %v1061_v34  ;;  %v620_v41 = vmax.f32 %v614_v38, 0.0 }
 0x13d   :  { %v617_v40 = vadd.f32 %v1063_v39, %v576_v37 }
 0x13f   :  { %v621_v42 = vmax.f32 %v617_v40, 0.0 }
 0x141   :  { %v622_v43 = vpack.c.bf16 %v621_v42, %v620_v41 }
 0x143   :  { %1099 = vmatmul.mubr.bf16.vlgmr.msra.gmra.mxu1 %v622_v43 }
 0x203   :  { %v728_v48 = vpop.f32.mrf.mxu1 }
 0x204   :  { %v729_v50 = vadd.f32 %v978_v47, %v728_v48 }
 0x205   :  { %v1100_v49 = vpop.f32.mrf.mxu1 }
 0x206   :  { %v735_v54 = vmax.f32 %v729_v50, 0.0 }
 0x207   :  { %v731_v51 = vpop.f32.mrf.mxu1 }
 0x208   :  { %v732_v52 = vadd.f32 %v978_v47, %v731_v51 }
 0x209   :  { %v1101_v53 = vpop.f32.mrf.mxu1 }
 0x20a   :  { %v736_v55 = vmax.f32 %v732_v52, 0.0 }
 0x20c   :  { %v737_v56 = vpack.c.bf16 %v736_v55, %v735_v54 }
 0x20e   :  { %1119 = vmatmul.mubr.bf16.vlgmr.msra.gmra.mxu0 %v737_v56 }
 0x2ce   :  { %v843_v58 = vpop.f32.mrf.mxu0 }
 0x2cf   :  { %v844_v59 = vadd.f32 %v987_v57, %v843_v58 }
 0x2d0   :  { %v1120_v60 = vpop.f32.mrf.mxu0 }
 0x2d1   :  { %v850_v62 = vmax.f32 %v844_v59, 0.0 }
 0x2d2   :  { %v846_v63 = vpop.f32.mrf.mxu0 }
 0x2d3   :  { %v847_v0 = vadd.f32 %v987_v57, %v846_v63  ;;  %v859_v1 = vmul.f32 %v996_v61, %v850_v62 }
 0x2d4   :  { %v1121_v2 = vpop.f32.mrf.mxu0 }
 0x2d5   :  { %v851_v3 = vmax.f32 %v847_v0, 0.0  ;;  %861 = vadd.xlane.f32.xlu0 %v859_v1 }
 0x2d7   :  { %v860_v4 = vmul.f32 %v996_v61, %v851_v3 }
 0x2d9   :  { %863 = vadd.xlane.f32.xlu0 %v860_v4 }
 0x35e   :  { %v862_v6 = vpop.xlane.xlu0 %861 }
 0x35f   :  { %v872_v7 = vadd.f32 %v997_v5, %v862_v6 }
 0x361   :  { %v876_v8 = vand.u32 2147483647, %v872_v7  ;;  %v874_v28 = vmax.f32 %v872_v7, 0.0 }
 0x362   :  { %v864_v9 = vpop.xlane.xlu0 %863 }
 0x363   :  { %v878_v10 = vsub.f32 0.0, %v876_v8  ;;  %v873_v11 = vadd.f32 %v997_v5, %v864_v9 }
 0x365   :  { %v880_v12 = vmul.f32 1.442695, %v878_v10  ;;  %v877_v13 = vand.u32 2147483647, %v873_v11  ;;  %v875_v35 = vmax.f32 %v873_v11, 0.0 }
 0x367   :  { %1197 = vpow2.f32 %v880_v12  ;;  %v879_v14 = vsub.f32 0.0, %v877_v13 }
 0x369   :  { %v882_v15 = vmul.f32 1.442695, %v879_v14 }
 0x36b   :  { %1199 = vpow2.f32 %v882_v15 }
 0x374   :  { %v1198_v16 = vpop.eup %1197 }
 0x375   :  { %v884_v17 = vadd.f32 1.0, %v1198_v16  ;;  %v887_v20 = vmul.f32 -0.5, %v1198_v16  ;;  %v890_v23 = vand.u32 2147483647, %v1198_v16 }
 0x377   :  { %1201 = vlog2.f32 %v884_v17  ;;  %v888_v21 = vadd.f32 1.0, %v887_v20  ;;  %vm891_vm1 = vcmp.lt.f32.partialorder %v890_v23, 0.0004427343 }
 0x378   :  { %v1200_v18 = vpop.eup %1199 }
 0x379   :  { %v893_v19 = vadd.f32 1.0, %v1200_v18  ;;  %v896_v22 = vmul.f32 -0.5, %v1200_v18  ;;  %v889_v26 = vmul.f32 %v1198_v16, %v888_v21  ;;  %v899_v29 = vand.u32 2147483647, %v1200_v18 }
 0x37b   :  { %1203 = vlog2.f32 %v893_v19  ;;  %v897_v27 = vadd.f32 1.0, %v896_v22  ;;  %vm900_vm3 = vcmp.lt.f32.partialorder %v899_v29, 0.0004427343 }
 0x37d   :  { %v898_v34 = vmul.f32 %v1200_v18, %v897_v27 }
 0x384   :  { %v1202_v24 = vpop.eup %1201 }
 0x385   :  { %v886_v25 = vmul.f32 0.6931472, %v1202_v24 }
 0x387   :  { %v892_v30 = vsel %vm891_vm1, %v889_v26, %v886_v25 }
 0x388   :  { %v1204_v31 = vpop.eup %1203  ;;  %v902_v32 = vadd.f32 %v892_v30, %v874_v28 }
 0x389   :  { %v895_v33 = vmul.f32 0.6931472, %v1204_v31 }
 0x38a   :  { %v909_v36 = vsub.f32 %v872_v7, %v902_v32  ;;  %v904_v37 = vsub.f32 0.0, %v902_v32 }
 0x38b   :  { %v901_v38 = vsel %vm900_vm3, %v898_v34, %v895_v33 }
 0x38c   :  { %913 = vrot.lane.b32.xlu1 %v909_v36, %s1301_s6  ;;  %v903_v39 = vadd.f32 %v901_v38, %v875_v35  ;;  %907 = vst.msk [vmem:[%s1427_s9] sm:$0xff] %vm906_vm2, %v904_v37 }
 0x38e   :  { %v910_v40 = vsub.f32 %v873_v11, %v903_v39  ;;  %v905_v41 = vsub.f32 0.0, %v903_v39 }
 0x390   :  { %915 = vrot.lane.b32.xlu1 %v910_v40, %s1301_s6  ;;  %908 = vst.msk [vmem:[%s1427_s9 + $0x8] sm:$0xff] %vm906_vm2, %v905_v41 }
 0x3fe   :  { %v914_v42 = vpop.permute.xlu1 %913 }
 0x3ff   :  { %920 = vst.msk [vmem:[%s1427_s9] sm:$0xff] %vm919_vm4, %v914_v42 }
 0x402   :  { %v916_v43 = vpop.permute.xlu1 %915 }
 0x403   :  { %921 = vst.msk [vmem:[%s1427_s9 + $0x8] sm:$0xff] %vm919_vm4, %v916_v43 }
 0x404   :  { %926 = vsyncpa [#allocation3], 1 }
 0x405   :  { %927 = vsyncpa [#allocation5], 1 }
 0x406   :  { %928 = vsyncpa [#allocation8], 1 }

</bundles_post_ra>
